<compile_context>
chip_gen: v6e
topology: v6e:2x2x1
jax: 0.10.0
libtpu: 0.0.40
codegen_flags: <defaults>
</compile_context>

<pallas_src>
import jax
import jax.numpy as jnp
from jax.experimental import pallas as pl
from jax.experimental.pallas import tpu as pltpu

# Synthetic column config (deterministic): 3 + 1 vertical input columns.
VERTICAL_INPUT_COLS = ("a", "b", "c")
ADDITIONAL_VERTICAL_INPUT_COLS = ("d",)
N_VERTICAL = len(VERTICAL_INPUT_COLS) + len(ADDITIONAL_VERTICAL_INPUT_COLS)  # 4


# --------------------------------------------------------------------------- #
# Kernel
# --------------------------------------------------------------------------- #
def _make_diff_kernel(n_feat: int, n_vert: int, seq_len: int):
    """Kernel for a native-layout (bblk, T, F) block -> (bblk, T, F + 4*n_vert)."""
    T = seq_len
    # Positive (modular) sublane-rotation amounts; T is static.
    sh_p1, sh_p2 = 1 % T, 2 % T
    sh_m1, sh_m2 = (T - 1) % T, (T - 2) % T

    def kernel(x_ref, o_ref):
        x = x_ref[...]                         # (bblk, T, F)
        v = x[:, :, :n_vert]                   # (bblk, T, n_vert)

        # Time index along the sublane (axis=1) dimension.
        t = jax.lax.broadcasted_iota(jnp.int32, v.shape, dimension=1)

        v_p1 = pltpu.roll(v, sh_p1, 1)         # v[t-1]  (wraps at t==0; masked)
        v_p2 = pltpu.roll(v, sh_p2, 1)         # v[t-2]
        v_m1 = pltpu.roll(v, sh_m1, 1)         # v[t+1]  (wraps at t==T-1; masked)
        v_m2 = pltpu.roll(v, sh_m2, 1)         # v[t+2]

        zero = jnp.zeros_like(v)
        d_f1 = v - v_p1                        # forward diff at t   (unmasked)
        d_f1_prev = v_p1 - v_p2                # forward diff at t-1
        d_b1 = v - v_m1                        # backward diff at t  (unmasked)
        d_b1_next = v_m1 - v_m2                # backward diff at t+1

        fd = jnp.where(t >= 1, d_f1, zero)
        fd2 = jnp.where(t >= 2, d_f1 - d_f1_prev, fd)       # t==1 -> fd, t==0 -> 0
        bd = jnp.where(t <= T - 2, d_b1, zero)
        bd2 = jnp.where(t <= T - 3, d_b1 - d_b1_next, bd)   # t==T-2 -> bd, t==T-1 -> 0

        # x flows load -> store untouched; the diff features are packed once.
        o_ref[:, :, :n_feat] = x
        o_ref[:, :, n_feat:] = jnp.concatenate([fd, fd2, bd, bd2], axis=-1)

    return kernel


# --------------------------------------------------------------------------- #
# Blocking / VMEM policy
# --------------------------------------------------------------------------- #
def _round_up(n: int, m: int) -> int:
    return -(-n // m) * m


def _padded_block_bytes(shape, dtype) -> int:
    """Physical VMEM footprint of a block: last dim pads to a multiple of 128
    lanes, second-to-last to the dtype sublane multiple (8/16/32)."""
    itemsize = jnp.dtype(dtype).itemsize
    sub = max(8, 32 // itemsize)       # 8 (f32/i32), 16 (bf16), 32 (i8/fp8)
    *lead, rows, cols = shape
    rows_p = _round_up(rows, sub)
    cols_p = _round_up(cols, 128)
    n_lead = 1
    for d in lead:
        n_lead *= int(d)
    return n_lead * rows_p * cols_p * itemsize


def _device_kind() -> str:
    try:
        return jax.devices()[0].device_kind.lower()
    except Exception:
        return ""


def _pick_batch_block(batch: int, per_batch_bytes: int, budget_bytes: int,
                      tc_per_chip: int) -> int:
    """Largest divisor of `batch` whose double-buffered (in + out) block fits the
    VMEM budget.  On multi-TensorCore chips prefer an even split of grid steps
    across the cores; on single-core chips never force a split."""
    divisors = [d for d in range(1, batch + 1) if batch % d == 0]
    fitting = [d for d in divisors if 2 * d * per_batch_bytes <= budget_bytes]
    if not fitting:
        return 1
    if tc_per_chip > 1:
        even = [d for d in fitting if (batch // d) % tc_per_chip == 0]
        if even:
            return max(even)
    return max(fitting)


# --------------------------------------------------------------------------- #
# Public entry point
# --------------------------------------------------------------------------- #
def base_model_forward(x: jax.Array, n_vertical: int = N_VERTICAL,
                       *, min_pallas_bytes: int = 0) -> jax.Array:
    """Pallas implementation of BaseModel.forward.  x: [B, T, F] -> [B, T, F+4*n_vertical]."""
    B, T, F = x.shape
    out_f = F + 4 * n_vertical
    itemsize = jnp.dtype(x.dtype).itemsize
    total_bytes = B * T * (F + out_f) * itemsize

    # Optional tiny-input short-circuit (kernel launch overhead dominates below
    # a few hundred KB).  Disabled by default so the kernel is actually run.
    if total_bytes < min_pallas_bytes:
        return _reference_forward(x, n_vertical)

    # Generation-aware policy.
    kind = _device_kind()
    tc_per_chip = 2 if ("v7" in kind or "7x" in kind) else 1          # v7x: 2 TCs
    is_v5e = ("v5 lite" in kind) or ("v5e" in kind) or ("v5lite" in kind)
    budget_bytes = (12 << 20) if is_v5e else (24 << 20)               # scoped-VMEM aware

    # Padding-aware per-batch footprint (physical (sublane, 128-lane) tiles).
    per_batch_bytes = (_padded_block_bytes((1, T, F), x.dtype)
                       + _padded_block_bytes((1, T, out_f), x.dtype))
    bblk = _pick_batch_block(B, per_batch_bytes, budget_bytes, tc_per_chip)

    # Double-buffered in + out blocks, plus headroom for compiler scratch.
    needed = 2 * bblk * per_batch_bytes
    vmem_cap = (56 << 20) if tc_per_chip > 1 else (112 << 20)         # v7x: 64 MiB physical
    vmem_limit = int(min(max(32 << 20, needed + (2 << 20)), vmem_cap))

    kernel = _make_diff_kernel(F, n_vertical, T)
    cost = pl.CostEstimate(flops=10 * B * T * n_vertical,
                           transcendentals=0,
                           bytes_accessed=total_bytes)

    # Last two block dims equal the full array dims -> the (8,128) rule is met.
    return pl.pallas_call(
        kernel,
        out_shape=jax.ShapeDtypeStruct((B, T, out_f), x.dtype),
        grid=(B // bblk,),
        in_specs=[pl.BlockSpec((bblk, T, F), lambda b: (b, 0, 0))],
        out_specs=pl.BlockSpec((bblk, T, out_f), lambda b: (b, 0, 0)),
        compiler_params=pltpu.CompilerParams(
            dimension_semantics=("parallel",),
            vmem_limit_bytes=vmem_limit),
        cost_estimate=cost,
    )(x)


# --------------------------------------------------------------------------- #
# Pure-JAX reference (matches the PyTorch semantics)
# --------------------------------------------------------------------------- #
def _reference_forward(x: jnp.ndarray, n_vertical: int = N_VERTICAL) -> jnp.ndarray:
    v = x[:, :, :n_vertical]
    z = jnp.zeros_like(v[:, :1, :])
    fd = jnp.concatenate([z, v[:, 1:, :] - v[:, :-1, :]], axis=1)
    fd2 = jnp.concatenate([z, fd[:, 1:, :] - fd[:, :-1, :]], axis=1)
    bd = jnp.concatenate([v[:, :-1, :] - v[:, 1:, :], z], axis=1)
    bd2 = jnp.concatenate([bd[:, :-1, :] - bd[:, 1:, :], z], axis=1)
    return jnp.concatenate([x, fd, fd2, bd, bd2], axis=-1)


if __name__ == "__main__":
    # Small deterministic input: batch=2, seq=16, features=8 (first 4 "vertical").
    B, T, F = 2, 16, 8
    key = jax.random.PRNGKey(0)
    x = jax.random.normal(key, (B, T, F), dtype=jnp.float32)

    out = jax.block_until_ready(base_model_forward(x))
    ref = _reference_forward(x)

    assert out.shape == (B, T, F + 4 * N_VERTICAL), out.shape
    assert jnp.allclose(out, ref, atol=1e-6, rtol=1e-6), "mismatch vs reference"

    print("KERNEL_OK")
</pallas_src>

<mosaic_0001>
module attributes {stable_mosaic.version = 11 : i64} {
  func.func @kernel(%arg0: i32, %arg1: memref<2x16x8xf32, #tpu.memory_space<vmem>>, %arg2: memref<2x16x24xf32, #tpu.memory_space<vmem>>) attributes {dimension_semantics = [#tpu.dimension_semantics<parallel>], iteration_bounds = array<i64: 1>, scalar_prefetch = 0 : i64, scratch_operands = 0 : i64, tpu.core_type = #tpu.core_type<tc>, window_params = [{transform_indices = @transform_0, window_bounds = array<i64: 2, 16, 8>}, {transform_indices = @transform_1, window_bounds = array<i64: 2, 16, 24>}]} {
    %c0 = arith.constant 0 : index
    %c0_0 = arith.constant 0 : index
    %c0_1 = arith.constant 0 : index
    %0 = vector.load %arg1[%c0, %c0_0, %c0_1] : memref<2x16x8xf32, #tpu.memory_space<vmem>>, vector<2x16x8xf32>
    %1 = vector.extract_strided_slice %0 {offsets = [0, 0, 0], sizes = [2, 16, 4], strides = [1, 1, 1]} : vector<2x16x8xf32> to vector<2x16x4xf32>
    %2 = tpu.iota {dimensions = array<i32: 1>} : vector<2x16x4xi32>
    %c1_i32 = arith.constant 1 : i32
    %3 = tpu.dynamic_rotate %1 by %c1_i32 dim 1 : vector<2x16x4xf32>, i32 -> vector<2x16x4xf32>
    %c2_i32 = arith.constant 2 : i32
    %4 = tpu.dynamic_rotate %1 by %c2_i32 dim 1 : vector<2x16x4xf32>, i32 -> vector<2x16x4xf32>
    %c15_i32 = arith.constant 15 : i32
    %5 = tpu.dynamic_rotate %1 by %c15_i32 dim 1 : vector<2x16x4xf32>, i32 -> vector<2x16x4xf32>
    %c14_i32 = arith.constant 14 : i32
    %6 = tpu.dynamic_rotate %1 by %c14_i32 dim 1 : vector<2x16x4xf32>, i32 -> vector<2x16x4xf32>
    %cst = arith.constant 0.000000e+00 : f32
    %7 = vector.broadcast %cst : f32 to vector<2x16x4xf32>
    %8 = arith.subf %1, %3 : vector<2x16x4xf32>
    %9 = arith.subf %3, %4 : vector<2x16x4xf32>
    %10 = arith.subf %1, %5 : vector<2x16x4xf32>
    %11 = arith.subf %5, %6 : vector<2x16x4xf32>
    %c1_i32_2 = arith.constant 1 : i32
    %12 = vector.broadcast %c1_i32_2 : i32 to vector<2x16x4xi32>
    %13 = arith.cmpi sge, %2, %12 : vector<2x16x4xi32>
    %14 = arith.select %13, %8, %7 : vector<2x16x4xi1>, vector<2x16x4xf32>
    %c2_i32_3 = arith.constant 2 : i32
    %15 = vector.broadcast %c2_i32_3 : i32 to vector<2x16x4xi32>
    %16 = arith.cmpi sge, %2, %15 : vector<2x16x4xi32>
    %17 = arith.subf %8, %9 : vector<2x16x4xf32>
    %18 = arith.select %16, %17, %14 : vector<2x16x4xi1>, vector<2x16x4xf32>
    %c14_i32_4 = arith.constant 14 : i32
    %19 = vector.broadcast %c14_i32_4 : i32 to vector<2x16x4xi32>
    %20 = arith.cmpi sle, %2, %19 : vector<2x16x4xi32>
    %21 = arith.select %20, %10, %7 : vector<2x16x4xi1>, vector<2x16x4xf32>
    %c13_i32 = arith.constant 13 : i32
    %22 = vector.broadcast %c13_i32 : i32 to vector<2x16x4xi32>
    %23 = arith.cmpi sle, %2, %22 : vector<2x16x4xi32>
    %24 = arith.subf %10, %11 : vector<2x16x4xf32>
    %25 = arith.select %23, %24, %21 : vector<2x16x4xi1>, vector<2x16x4xf32>
    %c0_5 = arith.constant 0 : index
    %c0_6 = arith.constant 0 : index
    %c0_7 = arith.constant 0 : index
    %26 = vector.load %arg2[%c0_5, %c0_6, %c0_7] : memref<2x16x24xf32, #tpu.memory_space<vmem>>, vector<2x16x8xf32>
    tpu.vector_store %arg2[%c0_5, %c0_6, %c0_7], %0 {strides = array<i32>} : memref<2x16x24xf32, #tpu.memory_space<vmem>>, vector<2x16x8xf32>,
    %27 = tpu.concatenate %14, %18, %21, %25 in 2 : vector<2x16x4xf32>, vector<2x16x4xf32>, vector<2x16x4xf32>, vector<2x16x4xf32> -> vector<2x16x16xf32>
    %c0_8 = arith.constant 0 : index
    %c0_9 = arith.constant 0 : index
    %c8 = arith.constant 8 : index
    %28 = vector.load %arg2[%c0_8, %c0_9, %c8] : memref<2x16x24xf32, #tpu.memory_space<vmem>>, vector<2x16x16xf32>
    tpu.vector_store %arg2[%c0_8, %c0_9, %c8], %27 {strides = array<i32>} : memref<2x16x24xf32, #tpu.memory_space<vmem>>, vector<2x16x16xf32>,
    return
  }
  func.func @transform_0(%arg0: i32) -> (i32, i32, i32) {
    %c0_i32 = arith.constant 0 : i32
    %c0_i32_0 = arith.constant 0 : i32
    %c0_i32_1 = arith.constant 0 : i32
    return %arg0, %c0_i32, %c0_i32_0 : i32, i32, i32
  }
  func.func @transform_1(%arg0: i32) -> (i32, i32, i32) {
    %c0_i32 = arith.constant 0 : i32
    %c0_i32_0 = arith.constant 0 : i32
    %c0_i32_1 = arith.constant 0 : i32
    return %arg0, %c0_i32, %c0_i32_0 : i32, i32, i32
  }
}

</mosaic_0001>

<bundles_post_ra>
// kernel: tpu_custom_call.1
= control target key start
LH: loop header
LB: loop body
LE: loop exit
PB: predicated region body
PF: predicated region fallthrough
CT: control target
= control target key end

     0   :  { %v13_v2 = vlaneseq  ;;  %s395_s0 = inlined_call_operand.vmem [shape: f32[2,16,8], index: 0, kind: input, shape index: {}]   ;;  %s396_s1 = inlined_call_operand.hbm [shape: f32[2,16,24], index: 1, kind: output, shape index: {}]  }
   0x1   :  { %v249_v0 = vld [vmem:[%s395_s0] sm:$0xff]  ;;  %v254_v1 = vld [vmem:[%s395_s0 + $0x8] sm:$0xff]  ;;  %v259_v3 = vld [vmem:[%s395_s0 + $0x10] sm:$0xff] }
   0x2   :  { %v34_v4 = vrot.slane %v249_v0, 1  ;;  %v36_v5 = vrot.slane %v254_v1, 1  ;;  %v266_v6 = vld [vmem:[%s395_s0 + $0x18] sm:$0xff]  ;;  %v268_v7 = vshrl.u32 %v13_v2, 7  ;;  %v43_v8 = vrot.slane %v249_v0, 2 }
   0x3   :  { %v45_v9 = vrot.slane %v254_v1, 2  ;;  %v16_v10 = vrot.slane %v249_v0, 7 }
   0x4   :  { %6 = vsyncpa [#allocation3], 0  ;;  %v18_v11 = vrot.slane %v254_v1, 7  ;;  %v25_v12 = vrot.slane %v249_v0, 6  ;;  %v17_v13 = vrot.slane %v259_v3, 7  ;;  %v19_v14 = vrot.slane %v266_v6, 7 }
   0x5   :  { %vm38_vm0 = vcmp.lt.s32.totalorder %v268_v7, 7  ;;  %v279_v15 = vadd.s32 8, %v268_v7  ;;  %vm20_vm1 = vcmp.lt.s32.totalorder %v268_v7, 1  ;;  %v27_v16 = vrot.slane %v254_v1, 6  ;;  %s231_s0 = smov 8   ;;  %s232_s14 = smov 4  }
   0x6   :  { %v285_v17 = vsel %vm38_vm0, %v34_v4, %v36_v5  ;;  %vm47_vm2 = vcmp.lt.s32.totalorder %v268_v7, 6  ;;  %v290_v18 = vsel %vm38_vm0, %v36_v5, %v34_v4  ;;  %v26_v21 = vrot.slane %v259_v3, 6  ;;  %s233_s15 = smov 12   ;;  %s234_s16 = smov [#allocation2]  }
   0x7   :  { %v60_v19 = vsub.f32 %v249_v0, %v285_v17  ;;  %v61_v20 = vsub.f32 %v254_v1, %v290_v18  ;;  %vm85_vm3 = vcmp.le.s32.totalorder %v279_v15, 14  ;;  %v21_v22 = vsel %vm20_vm1, %v16_v10, %v18_v11  ;;  %s193_s17 = sshll.u32 %s234_s16, 4  ;;  %s194_s17 = int_to_ptr.vmem [resolvable:$true] %s193_s17 }
   0x8   :  { %vm29_vm4 = vcmp.lt.s32.totalorder %v268_v7, 2  ;;  %v22_v23 = vsel %vm20_vm1, %v17_v13, %v19_v14  ;;  %v48_v24 = vsel %vm47_vm2, %v43_v8, %v45_v9  ;;  %v50_v25 = vsel %vm47_vm2, %v45_v9, %v43_v8  ;;  %s209_s18 = scalar_lea.vmem %s194_s17, 512  ;;  %p214_p1 = scmp.lt.s32.totalorder %s194_s17, %s194_s17 }
   0x9   :  { %125 = vrot.lane.b32.xlu0 %v60_v19, %s231_s0  ;;  %v87_v26 = vsel %vm85_vm3, %v61_v20, 0.0  ;;  %v30_v27 = vsel %vm29_vm4, %v25_v12, %v27_v16  ;;  %v314_v28 = vsub.f32 %v254_v1, %v21_v22  ;;  %v28_v30 = vrot.slane %v266_v6, 6  ;;  %p210_p0 = scmp.ne.s32.totalorder %s194_s17, %s209_s18  ;;  %p215_p2 = scmp.lt.s32.totalorder %s209_s18, %s209_s18 }
   0xa   :  { %127 = vrot.lane.b32.xlu1 %v87_v26, %s231_s0  ;;  %v57_v29 = vsub.f32 %v21_v22, %v30_v27  ;;  %v318_v31 = vsub.f32 %v266_v6, %v22_v23  ;;  %v23_v32 = vsel %vm20_vm1, %v18_v11, %v16_v10  ;;  %v32_v33 = vsel %vm29_vm4, %v27_v16, %v25_v12 }
   0xb   :  { %vm68_vm5 = vcmp.ge.s32.totalorder %v268_v7, 1  ;;  %vm74_vm6 = vcmp.ge.s32.totalorder %v268_v7, 2  ;;  %v31_v35 = vsel %vm29_vm4, %v26_v21, %v28_v30  ;;  %v52_v36 = vsub.f32 %v249_v0, %v23_v32  ;;  %p216_p3 = por %p215_p2, %p214_p1 }
   0xc   :  { %v77_v34 = vsub.f32 %v314_v28, %v57_v29  ;;  %v56_v37 = vsub.f32 %v23_v32, %v32_v33  ;;  %v59_v38 = vsub.f32 %v22_v23, %v31_v35  ;;  %v24_v39 = vsel %vm20_vm1, %v19_v14, %v17_v13 }
   0xd   :  { %v33_v40 = vsel %vm29_vm4, %v28_v30, %v26_v21  ;;  %v35_v41 = vrot.slane %v259_v3, 1  ;;  %v70_v42 = vsel %vm68_vm5, %v52_v36, 0.0  ;;  %v54_v44 = vsub.f32 %v259_v3, %v24_v39  ;;  %p217_p4 = pnand %p216_p3, %p210_p0 }
   0xe   :  { %111 = vrot.lane.b32.xlu0 %v77_v34, %s232_s14  ;;  %v76_v43 = vsub.f32 %v52_v36, %v56_v37  ;;  %v58_v45 = vsub.f32 %v24_v39, %v33_v40  ;;  %v79_v46 = vsub.f32 %v318_v31, %v59_v38  ;;  %v37_v47 = vrot.slane %v266_v6, 1 }
   0xf   :  { %v44_v48 = vrot.slane %v259_v3, 2  ;;  %v46_v49 = vrot.slane %v266_v6, 2  ;;  %v72_v51 = vsel %vm68_vm5, %v54_v44, 0.0  ;;  %v64_v53 = vsub.f32 %v285_v17, %v48_v24 }
  0x10   :  { %v80_v50 = vsel %vm74_vm6, %v76_v43, %v70_v42  ;;  %v78_v52 = vsub.f32 %v54_v44, %v58_v45  ;;  %115 = vrot.lane.b32.xlu1 %v79_v46, %s232_s14  ;;  %v40_v54 = vsel %vm38_vm0, %v35_v41, %v37_v47  ;;  %v42_v55 = vsel %vm38_vm0, %v37_v47, %v35_v41 }
  0x11   :  { %v65_v56 = vsub.f32 %v290_v18, %v50_v25  ;;  %v62_v58 = vsub.f32 %v259_v3, %v40_v54  ;;  %v63_v59 = vsub.f32 %v266_v6, %v42_v55  ;;  %v51_v60 = vsel %vm47_vm2, %v46_v49, %v44_v48 }
  0x12   :  { %109 = vrot.lane.b32.xlu0 %v80_v50, %s232_s14  ;;  %v82_v57 = vsel %vm74_vm6, %v78_v52, %v72_v51  ;;  %v49_v61 = vsel %vm47_vm2, %v44_v48, %v46_v49  ;;  %vm100_vm7 = vcmask 64512   ;;  %v92_v62 = vsub.f32 %v60_v19, %v64_v53 }
  0x13   :  { %101 = vst.msk [vmem:[#allocation2] sm:$0xff] %vm100_vm7, %v249_v0  ;;  %102 = vst.msk [vmem:[#allocation2 + $0x8] sm:$0xff] %vm100_vm7, %v254_v1  ;;  %v93_v63 = vsub.f32 %v61_v20, %v65_v56  ;;  %v67_v2 = vsub.f32 %v42_v55, %v51_v60  ;;  %v89_v4 = vsel %vm85_vm3, %v63_v59, 0.0  ;;  %v66_v5 = vsub.f32 %v40_v54, %v49_v61 }
  0x14   :  { %103 = vst.msk [vmem:[#allocation2 + $0x10] sm:$0xff] %vm100_vm7, %v259_v3  ;;  %104 = vst.msk [vmem:[#allocation2 + $0x18] sm:$0xff] %vm100_vm7, %v266_v6  ;;  %113 = vrot.lane.b32.xlu1 %v82_v57, %s232_s14  ;;  %vm91_vm8 = vcmp.le.s32.totalorder %v279_v15, 13  ;;  %vm153_vm9 = vcmask 31744   ;;  %vm162_vm10 = vcmask 97280   ;;  %vm183_vm11 = vcmask 195648  }
  0x15   :  { %v95_v0 = vsub.f32 %v63_v59, %v67_v2  ;;  %v97_v1 = vsel %vm91_vm8, %v93_v63, %v87_v26  ;;  %v94_v3 = vsub.f32 %v62_v58, %v66_v5 }
  0x16   :  { %129 = vrot.lane.b32.xlu0 %v62_v58, %s231_s0 }
  0x17   :  { %v99_v6 = vsel %vm91_vm8, %v95_v0, %v89_v4 }
  0x18   :  { %131 = vrot.lane.b32.xlu1 %v89_v4, %s231_s0 }
  0x1a   :  { %141 = vrot.lane.b32.xlu0 %v92_v62, %s233_s15 }
  0x1c   :  { %143 = vrot.lane.b32.xlu1 %v97_v1, %s233_s15 }
  0x1e   :  { %145 = vrot.lane.b32.xlu0 %v94_v3, %s233_s15 }
  0x20   :  { %147 = vrot.lane.b32.xlu1 %v99_v6, %s233_s15 }
  0x7b   :  { %v126_v7 = vpop.permute.xlu0 %125 }
  0x7c   :  { %v128_v8 = vpop.permute.xlu1 %127 }
  0x80   :  { %v112_v9 = vpop.permute.xlu0 %111 }
  0x81   :  { %v155_v16 = vsel %vm153_vm9, %v314_v28, %v112_v9 }
  0x82   :  { %v116_v10 = vpop.permute.xlu1 %115  ;;  %v159_v22 = vsel %vm100_vm7, %v155_v16, %v128_v8 }
  0x83   :  { %v157_v27 = vsel %vm153_vm9, %v318_v31, %v116_v10 }
  0x84   :  { %v110_v11 = vpop.permute.xlu0 %109 }
  0x85   :  { %v154_v14 = vsel %vm153_vm9, %v70_v42, %v110_v11 }
  0x86   :  { %v114_v12 = vpop.permute.xlu1 %113  ;;  %v158_v18 = vsel %vm100_vm7, %v154_v14, %v126_v7 }
  0x87   :  { %v156_v20 = vsel %vm153_vm9, %v72_v51, %v114_v12 }
  0x88   :  { %v130_v13 = vpop.permute.xlu0 %129 }
  0x89   :  { %v160_v23 = vsel %vm100_vm7, %v156_v20, %v130_v13 }
  0x8a   :  { %v132_v15 = vpop.permute.xlu1 %131 }
  0x8b   :  { %v161_v28 = vsel %vm100_vm7, %v157_v27, %v132_v15 }
  0x8c   :  { %v142_v17 = vpop.permute.xlu0 %141 }
  0x8d   :  { %v163_v19 = vsel %vm162_vm10, %v158_v18, %v142_v17 }
  0x8e   :  { %171 = vrot.lane.b32.xlu0 %v163_v19, %s231_s0  ;;  %v144_v21 = vpop.permute.xlu1 %143 }
  0x8f   :  { %v164_v24 = vsel %vm162_vm10, %v159_v22, %v144_v21 }
  0x90   :  { %v146_v25 = vpop.permute.xlu0 %145  ;;  %173 = vrot.lane.b32.xlu1 %v164_v24, %s231_s0 }
  0x91   :  { %v165_v26 = vsel %vm162_vm10, %v160_v23, %v146_v25 }
  0x92   :  { %175 = vrot.lane.b32.xlu0 %v165_v26, %s231_s0  ;;  %v148_v29 = vpop.permute.xlu1 %147 }
  0x93   :  { %v166_v30 = vsel %vm162_vm10, %v161_v28, %v148_v29 }
  0x94   :  { %177 = vrot.lane.b32.xlu1 %v166_v30, %s231_s0 }
 0x100   :  { %v172_v32 = vpop.permute.xlu0 %171 }
 0x101   :  { %184 = vst.msk [vmem:[#allocation2] sm:$0xff] %vm183_vm11, %v172_v32 }
 0x102   :  { %v174_v33 = vpop.permute.xlu1 %173 }
 0x103   :  { %185 = vst.msk [vmem:[#allocation2 + $0x8] sm:$0xff] %vm183_vm11, %v174_v33 }
 0x104   :  { %v176_v34 = vpop.permute.xlu0 %175 }
 0x105   :  { %186 = vst.msk [vmem:[#allocation2 + $0x10] sm:$0xff] %vm183_vm11, %v176_v34 }
 0x106   :  { %v178_v31 = vpop.permute.xlu1 %177 }
 0x107   :  { %187 = vst.msk [vmem:[#allocation2 + $0x18] sm:$0xff] %vm183_vm11, %v178_v31 }
 0x108   :  { %220 = shalt.err (!%p217_p4)
}
 0x109   :  { %s235_s19 = smov 128  }
 0x10a   :  { %199 = dma.vmem_to_hbm [thread:$0]  %s194_s17, 512, %s396_s1, [#allocation3], %s235_s19, %s235_s19, %s231_s0  }
 0x10b   :  { %229 = dma.done.wait [#allocation3], 512  }
 0x10c   :  { %230 = vsyncadd [#allocation3], 4294966784 }
 0x10d   :  { %203 = vsyncpa [#allocation3], 1 }

</bundles_post_ra>
